<compile_context>
chip_gen: v7x
topology: tpu7x:2x2x1
jax: 0.10.0
libtpu: 0.0.40
codegen_flags: <defaults>
</compile_context>

<pallas_src>
import jax
import jax.numpy as jnp
from jax.experimental import pallas as pl
from jax.experimental.pallas import tpu as pltpu


IN_DIM = 100          # affine1 in-features
HID_DIM = 200         # affine1 out / affine2 in
NUM_CHANNELS = 100    # affine2 out (num_channels)

# Lane-dense (multiple-of-128) padded feature dims fed to the kernel.
IN_P = 128            # 100 features + 1 "ones" lane (bias fold) + 27 zero lanes
HID_P = 256           # 200 hidden units + 1 synthetic bias unit + 55 zero lanes
OUT_P = 128           # 100 logits + 28 masked lanes

ONE_LANE = IN_DIM     # x lane that is always 1.0 -> carries b1 through matmul 1
UNIT_LANE = HID_DIM   # hidden lane that is always 1.0 -> carries b2 through matmul 2
NEG_INF = -1e30       # folded "bias" on padded logit lanes; exp underflows to 0


def _round_up(n, m):
    return (n + m - 1) // m * m


def _policy_kernel(x_ref, w1_ref, w2_ref, out_ref):
    """One batch tile: fused (x @ W1p -> relu) @ W2p -> stable row softmax.

    Biases / padded-lane masking are folded into W1p / W2p (see
    prepare_policy_params), so there are no bias inputs or broadcast adds.
    """
    x = x_ref[...]                                                          # (TB, 128)
    h = jnp.maximum(
        jnp.dot(x, w1_ref[...], preferred_element_type=jnp.float32), 0.0)  # (TB, 256)
    s = jnp.dot(h, w2_ref[...], preferred_element_type=jnp.float32)        # (TB, 128)

    # Numerically stable row-wise softmax.  Padded logit lanes carry -1e30 from
    # the folded W2p row, so exp underflows to exactly 0 and they drop out.
    m = jnp.max(s, axis=-1, keepdims=True)
    e = jnp.exp(s - m)
    denom = jnp.sum(e, axis=-1, keepdims=True)
    # Exact divide on the (TB, 1) denominator (NOT pl.reciprocal(approx=True)):
    # rows must sum to 1 to f32 accuracy for downstream Categorical sampling.
    out_ref[...] = (e * (1.0 / denom)).astype(out_ref.dtype)


def prepare_policy_params(w1, b1, w2, b2):
    """Pad + bias-fold the Linear parameters ONCE at model-setup time.

    w1: (100, 200) f32  (PyTorch affine1.weight transposed: (in, out))
    b1: (200,)     f32
    w2: (200, 100) f32  (affine2.weight transposed)
    b2: (100,)     f32
    Returns a dict of padded arrays to cache and reuse on every forward call.
    """
    w1 = jnp.asarray(w1, jnp.float32).reshape(IN_DIM, HID_DIM)
    b1 = jnp.asarray(b1, jnp.float32).reshape(HID_DIM)
    w2 = jnp.asarray(w2, jnp.float32).reshape(HID_DIM, NUM_CHANNELS)
    b2 = jnp.asarray(b2, jnp.float32).reshape(NUM_CHANNELS)

    # W1p: row ONE_LANE is multiplied by the always-1 lane of x, so it adds b1
    # pre-ReLU; column UNIT_LANE makes hidden unit 200 identically 1 (relu(1)=1).
    w1p = jnp.zeros((IN_P, HID_P), jnp.float32)
    w1p = w1p.at[:IN_DIM, :HID_DIM].set(w1)
    w1p = w1p.at[ONE_LANE, :HID_DIM].set(b1)
    w1p = w1p.at[ONE_LANE, UNIT_LANE].set(1.0)

    # W2p: row UNIT_LANE is multiplied by the always-1 hidden unit, adding b2 to
    # the real logits and -1e30 to the 28 padded logit lanes (softmax mask).
    w2p = jnp.zeros((HID_P, OUT_P), jnp.float32)
    w2p = w2p.at[:HID_DIM, :NUM_CHANNELS].set(w2)
    w2p = w2p.at[UNIT_LANE, :NUM_CHANNELS].set(b2)
    w2p = w2p.at[UNIT_LANE, NUM_CHANNELS:].set(NEG_INF)

    return {"w1p": w1p, "w2p": w2p}


def channel_policy_forward(x, params, *, block_b=None):
    """probs = softmax(relu(x @ W1 + b1) @ W2 + b2, axis=1).

    x: (B, 100) f32, params: output of prepare_policy_params (cached).
    Returns (B, 100) probabilities (rows sum to 1).
    """
    w1p, w2p = params["w1p"], params["w2p"]
    x = jnp.asarray(x, jnp.float32)
    B = x.shape[0]

    # Batch tile selection:
    #  * small batches: one sublane-aligned tile (launch-latency bound anyway);
    #  * large batches: 512-row tiles for HBM roofline, but keep >= 2 grid steps
    #    so the "parallel" batch axis can shard across both TensorCores on v7x.
    if block_b is None:
        if B <= 128:
            block_b = _round_up(max(B, 1), 8)
        else:
            block_b = 512
            while block_b > 128 and pl.cdiv(B, block_b) < 2:
                block_b //= 2
    pb = _round_up(B, block_b)

    # Per-call activation padding (the only per-call host-side data movement):
    # zero-pad to (pb, 128) and set the ones lane used by the bias fold.
    # Callers that keep activations in this padded layout across adjacent ops
    # can skip both this pad and the output slice below.
    xp = jnp.zeros((pb, IN_P), jnp.float32)
    xp = xp.at[:B, :IN_DIM].set(x)
    xp = xp.at[:, ONE_LANE].set(1.0)

    grid = (pb // block_b,)
    out = pl.pallas_call(
        _policy_kernel,
        out_shape=jax.ShapeDtypeStruct((pb, OUT_P), jnp.float32),
        grid=grid,
        in_specs=[
            pl.BlockSpec((block_b, IN_P), lambda i: (i, 0)),   # x: tiled over batch
            pl.BlockSpec((IN_P, HID_P), lambda i: (0, 0)),     # W1p (+b1): resident
            pl.BlockSpec((HID_P, OUT_P), lambda i: (0, 0)),    # W2p (+b2, mask): resident
        ],
        out_specs=pl.BlockSpec((block_b, OUT_P), lambda i: (i, 0)),
        compiler_params=pltpu.CompilerParams(
            dimension_semantics=("parallel",),   # batch tiles are independent
            vmem_limit_bytes=32 << 20,           # covers 512-row double-buffered tiles
        ),
    )(xp, w1p, w2p)

    # Lane-dense (128-wide) kernel output; slice off batch padding + the 28
    # padded channel lanes for the caller-facing (B, 100) result.
    return out[:B, :NUM_CHANNELS]


def _reference_forward(x, w1, b1, w2, b2):
    hp = jax.lax.Precision.HIGHEST
    h = jnp.maximum(jnp.dot(x, w1, precision=hp) + jnp.reshape(b1, (1, -1)), 0.0)
    s = jnp.dot(h, w2, precision=hp) + jnp.reshape(b2, (1, -1))
    return jax.nn.softmax(s, axis=1)


if __name__ == "__main__":
    key = jax.random.PRNGKey(0)
    k_x, k_w1, k_b1, k_w2, k_b2, k_x2 = jax.random.split(key, 6)

    # Deterministic parameter init (PyTorch Linear weight is (out, in); we store
    # the transpose (in, out) so the kernel computes x @ W).
    bound1 = 1.0 / jnp.sqrt(IN_DIM)
    w1 = jax.random.uniform(k_w1, (IN_DIM, HID_DIM), minval=-bound1, maxval=bound1,
                            dtype=jnp.float32)
    b1 = jax.random.uniform(k_b1, (HID_DIM,), minval=-bound1, maxval=bound1,
                            dtype=jnp.float32)
    bound2 = 1.0 / jnp.sqrt(HID_DIM)
    w2 = jax.random.uniform(k_w2, (HID_DIM, NUM_CHANNELS), minval=-bound2, maxval=bound2,
                            dtype=jnp.float32)
    b2 = jax.random.uniform(k_b2, (NUM_CHANNELS,), minval=-bound2, maxval=bound2,
                            dtype=jnp.float32)

    # Padded / bias-folded parameters built ONCE and reused for every call.
    params = prepare_policy_params(w1, b1, w2, b2)

    # Case 1: small batch (select_action-style), single grid step.
    B = 4
    x = jax.random.normal(k_x, (B, IN_DIM), dtype=jnp.float32)
    probs = jax.block_until_ready(channel_policy_forward(x, params))
    ref = _reference_forward(x, w1, b1, w2, b2)
    assert probs.shape == (B, NUM_CHANNELS)
    assert jnp.allclose(probs, ref, atol=1e-4, rtol=1e-3)
    assert jnp.allclose(jnp.sum(probs, axis=1), 1.0, atol=1e-3)

    # Case 2: exercise the batch grid (multiple tiles + batch padding).
    B2 = 20
    x2 = jax.random.normal(k_x2, (B2, IN_DIM), dtype=jnp.float32)
    probs2 = jax.block_until_ready(
        channel_policy_forward(x2, params, block_b=8))
    ref2 = _reference_forward(x2, w1, b1, w2, b2)
    assert probs2.shape == (B2, NUM_CHANNELS)
    assert jnp.allclose(probs2, ref2, atol=1e-4, rtol=1e-3)
    assert jnp.allclose(jnp.sum(probs2, axis=1), 1.0, atol=1e-3)

    # TODO(synk): select_action's eps-greedy Categorical sampling (numpy RNG,
    # torch.distributions) is host-side control flow and intentionally not in
    # the kernel.
    print("KERNEL_OK")
</pallas_src>

<mosaic_0001>
module attributes {stable_mosaic.version = 11 : i64} {
  func.func @_policy_kernel(%arg0: i32, %arg1: memref<8x128xf32, #tpu.memory_space<vmem>>, %arg2: memref<128x256xf32, #tpu.memory_space<vmem>>, %arg3: memref<256x128xf32, #tpu.memory_space<vmem>>, %arg4: memref<8x128xf32, #tpu.memory_space<vmem>>) attributes {dimension_semantics = [#tpu.dimension_semantics<parallel>], iteration_bounds = array<i64: 1>, scalar_prefetch = 0 : i64, scratch_operands = 0 : i64, tpu.core_type = #tpu.core_type<tc>, window_params = [{transform_indices = @transform_0, window_bounds = array<i64: 8, 128>}, {pipeline_mode = #tpu.pipeline_mode<synchronous>, transform_indices = @transform_1, window_bounds = array<i64: 128, 256>}, {pipeline_mode = #tpu.pipeline_mode<synchronous>, transform_indices = @transform_2, window_bounds = array<i64: 256, 128>}, {transform_indices = @transform_3, window_bounds = array<i64: 8, 128>}]} {
    %c0 = arith.constant 0 : index
    %c0_0 = arith.constant 0 : index
    %0 = vector.load %arg1[%c0, %c0_0] : memref<8x128xf32, #tpu.memory_space<vmem>>, vector<8x128xf32>
    %c0_1 = arith.constant 0 : index
    %c0_2 = arith.constant 0 : index
    %1 = vector.load %arg2[%c0_1, %c0_2] : memref<128x256xf32, #tpu.memory_space<vmem>>, vector<128x256xf32>
    %cst = arith.constant dense<0.000000e+00> : vector<8x256xf32>
    %2 = tpu.matmul %0, %1, %cst {dimension_numbers = #tpu.dot_dimension_numbers<[1], [0], [0], [1], [0, 0, 1, 1], [], []>} : vector<8x128xf32>, vector<128x256xf32>, vector<8x256xf32> -> vector<8x256xf32>
    %cst_3 = arith.constant 0.000000e+00 : f32
    %3 = vector.broadcast %cst_3 : f32 to vector<8x256xf32>
    %4 = arith.maximumf %2, %3 : vector<8x256xf32>
    %c0_4 = arith.constant 0 : index
    %c0_5 = arith.constant 0 : index
    %5 = vector.load %arg3[%c0_4, %c0_5] : memref<256x128xf32, #tpu.memory_space<vmem>>, vector<256x128xf32>
    %cst_6 = arith.constant dense<0.000000e+00> : vector<8x128xf32>
    %6 = tpu.matmul %4, %5, %cst_6 {dimension_numbers = #tpu.dot_dimension_numbers<[1], [0], [0], [1], [0, 0, 1, 1], [], []>} : vector<8x256xf32>, vector<256x128xf32>, vector<8x128xf32> -> vector<8x128xf32>
    %cst_7 = arith.constant dense<0xFF800000> : vector<8xf32>
    %7 = vector.multi_reduction <maximumf>, %6, %cst_7 [1] : vector<8x128xf32> to vector<8xf32>
    %8 = vector.shape_cast %7 : vector<8xf32> to vector<8x1xf32>
    %9 = vector.broadcast %8 : vector<8x1xf32> to vector<8x128xf32>
    %10 = arith.subf %6, %9 : vector<8x128xf32>
    %11 = math.exp %10 : vector<8x128xf32>
    %cst_8 = arith.constant dense<0.000000e+00> : vector<8xf32>
    %12 = vector.multi_reduction <add>, %11, %cst_8 [1] : vector<8x128xf32> to vector<8xf32>
    %13 = vector.shape_cast %12 : vector<8xf32> to vector<8x1xf32>
    %cst_9 = arith.constant 1.000000e+00 : f32
    %14 = vector.broadcast %cst_9 : f32 to vector<8x1xf32>
    %15 = arith.divf %14, %13 : vector<8x1xf32>
    %16 = vector.broadcast %15 : vector<8x1xf32> to vector<8x128xf32>
    %17 = arith.mulf %11, %16 : vector<8x128xf32>
    %c0_10 = arith.constant 0 : index
    %c0_11 = arith.constant 0 : index
    %18 = vector.load %arg4[%c0_10, %c0_11] : memref<8x128xf32, #tpu.memory_space<vmem>>, vector<8x128xf32>
    tpu.vector_store %arg4[%c0_10, %c0_11], %17 {strides = array<i32>} : memref<8x128xf32, #tpu.memory_space<vmem>>, vector<8x128xf32>,
    return
  }
  func.func @transform_0(%arg0: i32) -> (i32, i32) {
    %c0_i32 = arith.constant 0 : i32
    %c0_i32_0 = arith.constant 0 : i32
    return %arg0, %c0_i32 : i32, i32
  }
  func.func @transform_1(%arg0: i32) -> (i32, i32) {
    %c0_i32 = arith.constant 0 : i32
    %c0_i32_0 = arith.constant 0 : i32
    %c0_i32_1 = arith.constant 0 : i32
    return %c0_i32, %c0_i32_0 : i32, i32
  }
  func.func @transform_2(%arg0: i32) -> (i32, i32) {
    %c0_i32 = arith.constant 0 : i32
    %c0_i32_0 = arith.constant 0 : i32
    %c0_i32_1 = arith.constant 0 : i32
    return %c0_i32, %c0_i32_0 : i32, i32
  }
  func.func @transform_3(%arg0: i32) -> (i32, i32) {
    %c0_i32 = arith.constant 0 : i32
    %c0_i32_0 = arith.constant 0 : i32
    return %arg0, %c0_i32 : i32, i32
  }
}

</mosaic_0001>

<bundles_post_ra>
// kernel: tpu_custom_call.1
= control target key start
LH: loop header
LB: loop body
LE: loop exit
PB: predicated region body
PF: predicated region fallthrough
CT: control target
= control target key end

     0   :  { %8 = vsyncpa [#allocation3], 0  ;;  %s572_s0 = inlined_call_operand.hbm [shape: f32[8,128], index: 0, kind: input, shape index: {}]   ;;  %s573_s1 = inlined_call_operand.hbm [shape: f32[128,256], index: 1, kind: input, shape index: {}]   ;;  %s574_s2 = inlined_call_operand.hbm [shape: f32[256,128], index: 2, kind: input, shape index: {}]   ;;  %s575_s3 = inlined_call_operand.hbm [shape: f32[8,128], index: 3, kind: output, shape index: {}]  }
   0x1   :  { %9 = vsyncpa [#allocation6], 0 }
   0x2   :  { %10 = vsyncpa [#allocation4], 0  ;;  %s495_s12 = smov [#allocation5]   ;;  %s401_s16 = scalar_lea.hbm %s573_s1, 4096 }
   0x3   :  { %s26_s13 = sshll.u32 %s495_s12, 4  ;;  %p402_p0 = scmp.ne.s32.totalorder %s573_s1, %s401_s16  ;;  %s27_s13 = int_to_ptr.vmem [resolvable:$true] %s26_s13 }
   0x4   :  { %p405_p1 = scmp.lt.u32.totalorder %s401_s16, %s573_s1 }
   0x6   :  { %p407_p2 = pnand %p405_p1, %p402_p0 }
   0x8   :  { %410 = shalt.err (!%p407_p2)
}
   0x9   :  { %s411_s21 = scalar_lea.vmem %s27_s13, 4096  ;;  %p416_p4 = scmp.lt.s32.totalorder %s27_s13, %s27_s13 }
   0xa   :  { %p412_p3 = scmp.ne.s32.totalorder %s27_s13, %s411_s21  ;;  %p417_p5 = scmp.lt.s32.totalorder %s411_s21, %s411_s21 }
   0xc   :  { %p418_p6 = por %p417_p5, %p416_p4 }
   0xe   :  { %p419_p7 = pnand %p418_p6, %p412_p3 }
  0x10   :  { %422 = shalt.err (!%p419_p7)
}
  0x11   :  { %s496_s22 = smov 256   ;;  %s497_s23 = smov 16  }
  0x12   :  { %32 = dma.hbm_to_vmem [thread:$0]  %s573_s1, 4096, %s27_s13, [#allocation6], %s496_s22, %s496_s22, %s497_s23  }
  0x13   :  { %s498_s26 = smov [#allocation2]   ;;  %s499_s28 = smov [#allocation7]  }
  0x14   :  { %s17_s27 = sshll.u32 %s498_s26, 4  ;;  %s38_s29 = sshll.u32 %s499_s28, 4  ;;  %s18_s27 = int_to_ptr.vmem [resolvable:$true] %s17_s27  ;;  %s39_s29 = int_to_ptr.vmem [resolvable:$true] %s38_s29 }
  0x15   :  { %s423_s5 = scalar_lea.hbm %s572_s0, 128 }
  0x16   :  { %p424_p8 = scmp.ne.s32.totalorder %s572_s0, %s423_s5  ;;  %p427_p9 = scmp.lt.u32.totalorder %s423_s5, %s572_s0 }
  0x18   :  { %p429_p10 = pnand %p427_p9, %p424_p8 }
  0x1a   :  { %432 = shalt.err (!%p429_p10)
}
  0x1b   :  { %s433_s1 = scalar_lea.vmem %s18_s27, 128  ;;  %p438_p12 = scmp.lt.s32.totalorder %s18_s27, %s18_s27 }
  0x1c   :  { %p434_p11 = scmp.ne.s32.totalorder %s18_s27, %s433_s1  ;;  %p439_p13 = scmp.lt.s32.totalorder %s433_s1, %s433_s1 }
  0x1e   :  { %p440_p0 = por %p439_p13, %p438_p12 }
  0x20   :  { %p441_p1 = pnand %p440_p0, %p434_p11 }
  0x22   :  { %444 = shalt.err (!%p441_p1)
}
  0x23   :  { %20 = dma.hbm_to_vmem [thread:$0]  %s572_s0, 128, %s18_s27, [#allocation3]  }
  0x24   :  { %s445_s14 = scalar_lea.hbm %s574_s2, 4096 }
  0x25   :  { %p446_p2 = scmp.ne.s32.totalorder %s574_s2, %s445_s14  ;;  %p449_p3 = scmp.lt.u32.totalorder %s445_s14, %s574_s2 }
  0x27   :  { %p451_p4 = pnand %p449_p3, %p446_p2 }
  0x29   :  { %454 = shalt.err (!%p451_p4)
}
  0x2a   :  { %s455_s19 = scalar_lea.vmem %s39_s29, 4096  ;;  %p460_p6 = scmp.lt.s32.totalorder %s39_s29, %s39_s29 }
  0x2b   :  { %p456_p5 = scmp.ne.s32.totalorder %s39_s29, %s455_s19  ;;  %p461_p7 = scmp.lt.s32.totalorder %s455_s19, %s455_s19 }
  0x2d   :  { %p462_p8 = por %p461_p7, %p460_p6 }
  0x2f   :  { %p463_p9 = pnand %p462_p8, %p456_p5 }
  0x31   :  { %466 = shalt.err (!%p463_p9)
}
  0x32   :  { %s500_s0 = smov 128   ;;  %s501_s20 = smov 8  }
  0x33   :  { %44 = dma.hbm_to_vmem [thread:$0]  %s574_s2, 4096, %s39_s29, [#allocation6], %s500_s0, %s500_s0, %s501_s20  }
  0x34   :  { %489 = dma.done.wait [#allocation3], 128  }
  0x35   :  { %490 = vsyncadd [#allocation3], 4294967168 }
  0x36   :  { %491 = dma.done.wait [#allocation6], 8192  }
  0x37   :  { %492 = vsyncadd [#allocation6], 4294959104  ;;  %v502_v0 = vmov 0.0   ;;  %v56_v1 = vld [vmem:[#allocation5 + $0x8] sm:$0xff]  ;;  %v58_v2 = vld [vmem:[#allocation5 + $0x18] sm:$0xff]  ;;  %s503_s2 = smov [#allocation8]  }
  0x38   :  { %151 = vmatprep.mubr.f32.mxu0 %v502_v0  ;;  %v55_v3 = vld [vmem:[#allocation5] sm:$0xff]  ;;  %v324_v4 = vpack.c.bf16 %v58_v2, %v56_v1  ;;  %v57_v5 = vld [vmem:[#allocation5 + $0x10] sm:$0xff]  ;;  %v60_v6 = vld [vmem:[#allocation5 + $0x28] sm:$0xff]  ;;  %s279_s23 = sshll.u32 %s503_s2, 4  ;;  %s280_s23 = int_to_ptr.vmem [resolvable:$true] %s279_s23 }
  0x39   :  { %v62_v7 = vld [vmem:[#allocation5 + $0x38] sm:$0xff]  ;;  %v326_v8 = vpack.c.bf16 %v57_v5, %v55_v3  ;;  %v59_v10 = vld [vmem:[#allocation5 + $0x20] sm:$0xff]  ;;  %v61_v11 = vld [vmem:[#allocation5 + $0x30] sm:$0xff]  ;;  %s467_s24 = scalar_lea.vmem %s280_s23, 128  ;;  %p472_p11 = scmp.lt.s32.totalorder %s280_s23, %s280_s23 }
  0x3a   :  { %v328_v9 = vpack.c.bf16 %v62_v7, %v60_v6  ;;  %v64_v12 = vld [vmem:[#allocation5 + $0x48] sm:$0xff]  ;;  %325 = vmatprep.subr.bf16.mxu0 %v324_v4  ;;  %v66_v13 = vld [vmem:[#allocation5 + $0x58] sm:$0xff]  ;;  %v330_v14 = vpack.c.bf16 %v61_v11, %v59_v10  ;;  %v63_v16 = vld [vmem:[#allocation5 + $0x40] sm:$0xff]  ;;  %p468_p10 = scmp.ne.s32.totalorder %s280_s23, %s467_s24  ;;  %p473_p12 = scmp.lt.s32.totalorder %s467_s24, %s467_s24 }
  0x3b   :  { %327 = vmatpush1.bf16.msra.mxu0 %v326_v8  ;;  %v332_v15 = vpack.c.bf16 %v66_v13, %v64_v12  ;;  %v65_v17 = vld [vmem:[#allocation5 + $0x50] sm:$0xff]  ;;  %v68_v18 = vld [vmem:[#allocation5 + $0x68] sm:$0xff]  ;;  %v70_v19 = vld [vmem:[#allocation5 + $0x78] sm:$0xff] }
  0x3c   :  { %329 = vmatprep.subr.bf16.mxu0 %v328_v9  ;;  %v334_v20 = vpack.c.bf16 %v65_v17, %v63_v16  ;;  %v336_v21 = vpack.c.bf16 %v70_v19, %v68_v18  ;;  %v67_v22 = vld [vmem:[#allocation5 + $0x60] sm:$0xff]  ;;  %v69_v23 = vld [vmem:[#allocation5 + $0x70] sm:$0xff]  ;;  %v72_v24 = vld [vmem:[#allocation5 + $0x88] sm:$0xff]  ;;  %p474_p13 = por %p473_p12, %p472_p11 }
  0x3d   :  { %v74_v25 = vld [vmem:[#allocation5 + $0x98] sm:$0xff]  ;;  %v71_v26 = vld [vmem:[#allocation5 + $0x80] sm:$0xff]  ;;  %v73_v27 = vld [vmem:[#allocation5 + $0x90] sm:$0xff]  ;;  %v338_v31 = vpack.c.bf16 %v69_v23, %v67_v22 }
  0x3e   :  { %v176_v28 = vld [vmem:[#allocation7 + $0x80] sm:$0xff]  ;;  %v177_v29 = vld [vmem:[#allocation7 + $0x88] sm:$0xff]  ;;  %v178_v34 = vld [vmem:[#allocation7 + $0x90] sm:$0xff]  ;;  %v340_v36 = vpack.c.bf16 %v74_v25, %v72_v24  ;;  %v342_v46 = vpack.c.bf16 %v73_v27, %v71_v26  ;;  %p475_p0 = pnand %p474_p13, %p468_p10 }
  0x3f   :  { %331 = vmatpush1.bf16.msra.mxu0 %v330_v14  ;;  %v160_v30 = vld [vmem:[#allocation7] sm:$0xff]  ;;  %v356_v32 = vpack.c.bf16 %v177_v29, %v176_v28  ;;  %v161_v33 = vld [vmem:[#allocation7 + $0x8] sm:$0xff]  ;;  %v179_v35 = vld [vmem:[#allocation7 + $0x98] sm:$0xff] }
  0x40   :  { %333 = vmatprep.subr.bf16.mxu0 %v332_v15  ;;  %v358_v37 = vpack.c.bf16 %v161_v33, %v160_v30  ;;  %v360_v38 = vpack.c.bf16 %v179_v35, %v178_v34  ;;  %v162_v39 = vld [vmem:[#allocation7 + $0x10] sm:$0xff]  ;;  %v163_v40 = vld [vmem:[#allocation7 + $0x18] sm:$0xff]  ;;  %v180_v41 = vld [vmem:[#allocation7 + $0xa0] sm:$0xff] }
  0x41   :  { %v76_v42 = vld [vmem:[#allocation5 + $0xa8] sm:$0xff]  ;;  %v78_v43 = vld [vmem:[#allocation5 + $0xb8] sm:$0xff]  ;;  %357 = vmatprep.subr.bf16.mxu1 %v356_v32  ;;  %v362_v45 = vpack.c.bf16 %v163_v40, %v162_v39  ;;  %v75_v47 = vld [vmem:[#allocation5 + $0xa0] sm:$0xff] }
  0x42   :  { %v181_v44 = vld [vmem:[#allocation7 + $0xa8] sm:$0xff]  ;;  %359 = vmatpush3.bf16.msra.mxu1 %v358_v37  ;;  %v164_v49 = vld [vmem:[#allocation7 + $0x20] sm:$0xff]  ;;  %v344_v51 = vpack.c.bf16 %v78_v43, %v76_v42  ;;  %v77_v52 = vld [vmem:[#allocation5 + $0xb0] sm:$0xff] }
  0x43   :  { %335 = vmatpush1.bf16.msra.mxu0 %v334_v20  ;;  %361 = vmatprep.subr.bf16.mxu1 %v360_v38  ;;  %v364_v48 = vpack.c.bf16 %v181_v44, %v180_v41  ;;  %v165_v50 = vld [vmem:[#allocation7 + $0x28] sm:$0xff]  ;;  %v182_v53 = vld [vmem:[#allocation7 + $0xb0] sm:$0xff]  ;;  %v183_v54 = vld [vmem:[#allocation7 + $0xb8] sm:$0xff]  ;;  %v346_v58 = vpack.c.bf16 %v77_v52, %v75_v47 }
  0x44   :  { %337 = vmatprep.subr.bf16.mxu0 %v336_v21  ;;  %v80_v55 = vld [vmem:[#allocation5 + $0xc8] sm:$0xff]  ;;  %v82_v56 = vld [vmem:[#allocation5 + $0xd8] sm:$0xff]  ;;  %v366_v57 = vpack.c.bf16 %v165_v50, %v164_v49  ;;  %v79_v59 = vld [vmem:[#allocation5 + $0xc0] sm:$0xff]  ;;  %v368_v60 = vpack.c.bf16 %v183_v54, %v182_v53 }
  0x45   :  { %v166_v61 = vld [vmem:[#allocation7 + $0x30] sm:$0xff]  ;;  %v167_v62 = vld [vmem:[#allocation7 + $0x38] sm:$0xff]  ;;  %v348_v63 = vpack.c.bf16 %v82_v56, %v80_v55  ;;  %v184_v1 = vld [vmem:[#allocation7 + $0xc0] sm:$0xff] }
  0x46   :  { %363 = vmatpush3.bf16.msra.mxu1 %v362_v45  ;;  %v81_v0 = vld [vmem:[#allocation5 + $0xd0] sm:$0xff]  ;;  %v185_v2 = vld [vmem:[#allocation7 + $0xc8] sm:$0xff]  ;;  %v86_v4 = vld [vmem:[#allocation5 + $0xf8] sm:$0xff]  ;;  %v370_v5 = vpack.c.bf16 %v167_v62, %v166_v61 }
  0x47   :  { %339 = vmatpush1.bf16.msra.mxu0 %v338_v31  ;;  %365 = vmatprep.subr.bf16.mxu1 %v364_v48  ;;  %v84_v3 = vld [vmem:[#allocation5 + $0xe8] sm:$0xff]  ;;  %v350_v6 = vpack.c.bf16 %v81_v0, %v79_v59  ;;  %v83_v7 = vld [vmem:[#allocation5 + $0xe0] sm:$0xff]  ;;  %v372_v8 = vpack.c.bf16 %v185_v2, %v184_v1  ;;  %v85_v12 = vld [vmem:[#allocation5 + $0xf0] sm:$0xff] }
  0x48   :  { %341 = vmatprep.subr.bf16.mxu0 %v340_v36  ;;  %v168_v9 = vld [vmem:[#allocation7 + $0x40] sm:$0xff]  ;;  %v169_v10 = vld [vmem:[#allocation7 + $0x48] sm:$0xff]  ;;  %v352_v11 = vpack.c.bf16 %v86_v4, %v84_v3  ;;  %v186_v13 = vld [vmem:[#allocation7 + $0xd0] sm:$0xff]  ;;  %v354_v16 = vpack.c.bf16 %v85_v12, %v83_v7 }
  0x49   :  { %v187_v14 = vld [vmem:[#allocation7 + $0xd8] sm:$0xff]  ;;  %v374_v15 = vpack.c.bf16 %v169_v10, %v168_v9  ;;  %v170_v18 = vld [vmem:[#allocation7 + $0x50] sm:$0xff]  ;;  %v188_v20 = vld [vmem:[#allocation7 + $0xe0] sm:$0xff] }
  0x4a   :  { %367 = vmatpush3.bf16.msra.mxu1 %v366_v57  ;;  %v376_v17 = vpack.c.bf16 %v187_v14, %v186_v13  ;;  %v171_v19 = vld [vmem:[#allocation7 + $0x58] sm:$0xff]  ;;  %v189_v21 = vld [vmem:[#allocation7 + $0xe8] sm:$0xff]  ;;  %v172_v25 = vld [vmem:[#allocation7 + $0x60] sm:$0xff] }
  0x4b   :  { %343 = vmatpush1.bf16.msra.mxu0 %v342_v46  ;;  %369 = vmatprep.subr.bf16.mxu1 %v368_v60  ;;  %v378_v22 = vpack.c.bf16 %v171_v19, %v170_v18  ;;  %v54_v23 = vld [vmem:[#allocation2] sm:$0xff]  ;;  %v380_v24 = vpack.c.bf16 %v189_v21, %v188_v20  ;;  %v173_v26 = vld [vmem:[#allocation7 + $0x68] sm:$0xff]  ;;  %v190_v28 = vld [vmem:[#allocation7 + $0xf0] sm:$0xff] }
  0x4c   :  { %345 = vmatprep.subr.bf16.mxu0 %v344_v51  ;;  %v382_v27 = vpack.c.bf16 %v173_v26, %v172_v25  ;;  %v191_v29 = vld [vmem:[#allocation7 + $0xf8] sm:$0xff]  ;;  %v174_v31 = vld [vmem:[#allocation7 + $0x70] sm:$0xff] }
  0x4d   :  { %v384_v30 = vpack.c.bf16 %v191_v29, %v190_v28  ;;  %v175_v32 = vld [vmem:[#allocation7 + $0x78] sm:$0xff] }
  0x4e   :  { %371 = vmatpush3.bf16.msra.mxu1 %v370_v5  ;;  %v386_v33 = vpack.c.bf16 %v175_v32, %v174_v31 }
  0x4f   :  { %347 = vmatpush1.bf16.msra.mxu0 %v346_v58  ;;  %373 = vmatprep.subr.bf16.mxu1 %v372_v8 }
  0x50   :  { %349 = vmatprep.subr.bf16.mxu0 %v348_v63 }
  0x52   :  { %375 = vmatpush3.bf16.msra.mxu1 %v374_v15 }
  0x53   :  { %351 = vmatpush1.bf16.msra.mxu0 %v350_v6  ;;  %377 = vmatprep.subr.bf16.mxu1 %v376_v17 }
  0x54   :  { %353 = vmatprep.subr.bf16.mxu0 %v352_v11 }
  0x56   :  { %379 = vmatpush3.bf16.msra.mxu1 %v378_v22 }
  0x57   :  { %355 = vmatpush1.bf16.msra.mxu0 %v354_v16  ;;  %381 = vmatprep.subr.bf16.mxu1 %v380_v24 }
  0x5a   :  { %152 = vmatmul.mubr.f32.vlgmr.msra.gmra.mrb[0].mxu0 %v54_v23  ;;  %383 = vmatpush3.bf16.msra.mxu1 %v382_v27 }
  0x5b   :  { %385 = vmatprep.subr.bf16.mxu1 %v384_v30 }
  0x5e   :  { %387 = vmatpush3.bf16.msra.mxu1 %v386_v33 }
 0x12d   :  { %v153_v34 = vpop.f32.mrb[0].mxu0 }
 0x12e   :  { %v155_v35 = vpop.f32.mrb[1].mxu0  ;;  %v158_v37 = vmax.f32 %v153_v34, 0.0 }
 0x12f   :  { %v159_v36 = vmax.f32 %v155_v35, 0.0 }
 0x131   :  { %256 = vmatprep.mubr.f32.mxu1 %v159_v36 }
 0x132   :  { %257 = vmatmul.mubr.f32.vlgmr.msra.gmra.mrb[0].mxu1 %v158_v37 }
 0x205   :  { %v321_v38 = vpop.f32.mrb[0].mxu1 }
 0x206   :  { %v322_v39 = vpop.f32.mrb[1].mxu1 }
 0x207   :  { %v323_v40 = vadd.f32 %v322_v39, %v321_v38 }
 0x209   :  { %262 = vmax.xlane.f32.xlu0 %v323_v40 }
 0x296   :  { %v263_v41 = vpop.xlane.xlu0 %262 }
 0x297   :  { %v264_v42 = vsub.f32 %v323_v40, %v263_v41 }
 0x299   :  { %v265_v43 = vmul.f32 1.442695, %v264_v42 }
 0x29b   :  { %397 = vpow2.f32 %v265_v43 }
 0x2a5   :  { %v398_v44 = vpop.eup %397 }
 0x2a6   :  { %267 = vadd.xlane.f32.xlu0 %v398_v44 }
 0x333   :  { %v268_v45 = vpop.xlane.xlu0 %267 }
 0x334   :  { %399 = vrcp.f32 %v268_v45 }
 0x33e   :  { %v400_v46 = vpop.eup %399 }
 0x33f   :  { %v271_v47 = vmul.f32 %v400_v46, %v398_v44 }
 0x341   :  { %272 = vst [vmem:[#allocation8] sm:$0xff] %v271_v47 }
 0x342   :  { %478 = shalt.err (!%p475_p0)
}
 0x343   :  { %s479_s27 = scalar_lea.hbm %s575_s3, 128 }
 0x344   :  { %p480_p1 = scmp.ne.s32.totalorder %s575_s3, %s479_s27  ;;  %p483_p2 = scmp.lt.u32.totalorder %s479_s27, %s575_s3 }
 0x346   :  { %p485_p3 = pnand %p483_p2, %p480_p1 }
 0x348   :  { %488 = shalt.err (!%p485_p3)
}
 0x349   :  { %282 = dma.vmem_to_hbm [thread:$0]  %s280_s23, 128, %s575_s3, [#allocation4]  }
 0x34a   :  { %493 = dma.done.wait [#allocation4], 128  }
 0x34b   :  { %494 = vsyncadd [#allocation4], 4294967168 }
 0x34c   :  { %286 = vsyncpa [#allocation3], 1 }
 0x34d   :  { %287 = vsyncpa [#allocation6], 1 }
 0x34e   :  { %288 = vsyncpa [#allocation4], 1 }

</bundles_post_ra>
